<compile_context>
chip_gen: v7x
topology: tpu7x:2x2x1
jax: 0.10.0
libtpu: 0.0.40
codegen_flags: <defaults>
</compile_context>

<pallas_src>
import jax
import jax.numpy as jnp
from jax.experimental import pallas as pl
from jax.experimental.pallas import tpu as pltpu


def _adjoint_kernel(zl_ref, acat_ref, bcat_ref, o_ref):
    # Stage 1: [P | Q] = [Ar | Ai] @ [[Zr, Zi], [-Zi, Zr]]     -> (tm, 2Wp)
    pq = jnp.dot(acat_ref[...], zl_ref[...], preferred_element_type=jnp.float32)
    # Stage 2: Y = P Br - Q Bi = [P | Q] @ [[Br], [-Bi]]       -> (tm, Wp)
    pq = pq.astype(bcat_ref.dtype)
    o_ref[...] = jnp.dot(pq, bcat_ref[...],
                         preferred_element_type=jnp.float32).astype(o_ref.dtype)


def _round_up(n, m):
    return ((n + m - 1) // m) * m


def _idft_matrices(n):
    """Ortho inverse-DFT matrix of size n split into (real, imag).

    Phase is built from the exact integer (k*l) mod n so f32 cannot lose
    low-order bits of the large k*l products at realistic MRI sizes."""
    k = jnp.arange(n, dtype=jnp.int32)
    kl_mod = (k[:, None] * k[None, :]) % n
    phase = (2.0 * jnp.pi / n) * kl_mod.astype(jnp.float32)
    scale = jnp.float32(float(n) ** -0.5)
    return jnp.cos(phase) * scale, jnp.sin(phase) * scale


def _pick_tm(Hp, B):
    """Largest divisor of Hp that is a multiple of 8 and <= 128."""
    tm = 8
    for cand in range(8, min(Hp, 128) + 1, 8):
        if Hp % cand == 0:
            tm = cand
    # v7x has 2 TensorCores sharded over parallel grid axes: guarantee >= 2
    # grid points even when B == 1.
    if B == 1 and Hp // tm < 2:
        tm = max(8, tm // 2)
    return tm


def _build_call(B, Hp, Wp, tm, vmem_limit, cost):
    nrow = Hp // tm
    zl_spec = pl.BlockSpec((pl.Squeezed(), 2 * Hp, 2 * Wp), lambda b, i: (b, 0, 0))
    a_spec = pl.BlockSpec((tm, 2 * Hp), lambda b, i: (i, 0))
    out_spec = pl.BlockSpec((pl.Squeezed(), tm, Wp), lambda b, i: (b, i, 0))
    if hasattr(pl, "Buffered"):
        # B_cat's block index never changes: single-buffer it to save VMEM.
        b_spec = pl.BlockSpec((2 * Wp, Wp), lambda b, i: (0, 0),
                              pipeline_mode=pl.Buffered(1))
    else:
        b_spec = pl.BlockSpec((2 * Wp, Wp), lambda b, i: (0, 0))
    return pl.pallas_call(
        _adjoint_kernel,
        out_shape=jax.ShapeDtypeStruct((B, Hp, Wp), jnp.float32),
        grid_spec=pltpu.PrefetchScalarGridSpec(
            num_scalar_prefetch=0,
            grid=(B, nrow),
            in_specs=[zl_spec, a_spec, b_spec],
            out_specs=out_spec,
        ),
        compiler_params=pltpu.CompilerParams(
            dimension_semantics=("parallel", "parallel"),
            vmem_limit_bytes=vmem_limit),
        cost_estimate=cost,
    )


def mri_singlecoil_adjoint(x, mask, use_bf16=False):
    """x: complex (B, H, W); mask: (H, W) numeric {0,1}. Returns float32 (B, H, W).

    use_bf16=True feeds bf16 operands to the MXU (f32 accumulation): ~3x faster
    on v6e/v7x and the recommended default there once end-to-end error has been
    validated at the deployment (H, W)."""
    B, H, W = x.shape
    Hp = _round_up(H, 64)     # 2Hp (lane dim of A_cat, contracted dim) stays 128-aligned
    Wp = _round_up(W, 128)    # lane-dense output stores
    cdt = jnp.bfloat16 if use_bf16 else jnp.float32

    # Mask multiply folded into the wrapper (XLA fuses it into the pad/cast).
    mask_f = mask.astype(jnp.float32)
    zr = jnp.real(x).astype(jnp.float32) * mask_f
    zi = jnp.imag(x).astype(jnp.float32) * mask_f
    pad_hw = lambda a: jnp.pad(a, ((0, 0), (0, Hp - H), (0, Wp - W)))
    zr, zi = pad_hw(zr), pad_hw(zi)
    # ZL = [[Zr, Zi], [-Zi, Zr]] built ONCE per batch here (not per row tile).
    zl = jnp.concatenate(
        [jnp.concatenate([zr, zi], axis=2),
         jnp.concatenate([-zi, zr], axis=2)], axis=1).astype(cdt)   # (B, 2Hp, 2Wp)

    ar, ai = _idft_matrices(H)
    br, bi = _idft_matrices(W)
    ar = jnp.pad(ar, ((0, Hp - H), (0, Hp - H)))
    ai = jnp.pad(ai, ((0, Hp - H), (0, Hp - H)))
    br = jnp.pad(br, ((0, Wp - W), (0, Wp - W)))
    bi = jnp.pad(bi, ((0, Wp - W), (0, Wp - W)))
    a_cat = jnp.concatenate([ar, ai], axis=1).astype(cdt)     # (Hp, 2Hp)
    b_cat = jnp.concatenate([br, -bi], axis=0).astype(cdt)    # (2Wp, Wp); B^T == B

    tm = _pick_tm(Hp, B)

    isz = 2 if use_bf16 else 4
    nb_b = 1 if hasattr(pl, "Buffered") else 2
    est = (2 * (2 * Hp) * (2 * Wp) * isz    # ZL blocks (double-buffered)
           + 2 * tm * (2 * Hp) * isz        # A_cat tiles (double-buffered)
           + nb_b * (2 * Wp) * Wp * isz     # B_cat
           + 2 * tm * Wp * 4                # output tiles (double-buffered, f32)
           + tm * (2 * Wp) * 4              # PQ accumulator (f32)
           + tm * (2 * Wp) * isz            # PQ cast copy fed to dot #2
           + tm * Wp * 4)                   # dot #2 accumulator (f32)
    # Tight estimate * margin, floored at the common 32 MiB scoped default and
    # capped at 56 MiB so v7x (64 MiB physical VMEM/TC) keeps headroom.
    # TODO(synk): on v5e/v6e (128 MiB physical VMEM) the cap could be raised
    # for very large H, W and A_cat kept fully resident.
    vmem_limit = int(min(56 * 2**20, max(32 * 2**20, int(est * 1.3))))

    flops = B * (8 * Hp * Hp * Wp + 4 * Hp * Wp * Wp)
    bytes_accessed = (B * (4 * Hp * Wp * isz          # ZL
                           + Hp * Wp * 4              # output
                           + 2 * Hp * Hp * isz)       # A_cat re-streamed per batch
                      + 2 * Wp * Wp * isz)            # B_cat (once)
    cost = pl.CostEstimate(flops=flops, transcendentals=0,
                           bytes_accessed=bytes_accessed)

    y = _build_call(B, Hp, Wp, tm, vmem_limit, cost)(zl, a_cat, b_cat)
    return y[:, :H, :W]


if __name__ == "__main__":
    key = jax.random.PRNGKey(0)
    B, H, W = 2, 16, 16

    k_r, k_i, k_m = jax.random.split(key, 3)
    xr = jax.random.normal(k_r, (B, H, W), dtype=jnp.float32)
    xi = jax.random.normal(k_i, (B, H, W), dtype=jnp.float32)
    x = (xr + 1j * xi).astype(jnp.complex64)

    # Deterministic binary sampling mask (emulates mask.long())
    mask = (jax.random.uniform(k_m, (H, W)) > 0.5).astype(jnp.int32)

    # Reference: XLA FFT
    y_ref = jnp.real(jnp.fft.ifft2(x * mask.astype(jnp.complex64), norm="ortho"))

    # f32 MXU path (default): matches torch/XLA ifft2 tightly.
    y = mri_singlecoil_adjoint(x, mask)
    y = jax.block_until_ready(y)
    assert y.shape == (B, H, W) and y.dtype == jnp.float32
    assert jnp.allclose(y, y_ref, atol=1e-4, rtol=1e-4)

    # bf16-operand path (recommended on v6e/v7x): looser tolerance.
    y_bf16 = jax.block_until_ready(mri_singlecoil_adjoint(x, mask, use_bf16=True))
    assert y_bf16.shape == (B, H, W) and y_bf16.dtype == jnp.float32
    assert jnp.allclose(y_bf16, y_ref, atol=5e-2, rtol=5e-2)

    print("KERNEL_OK")
</pallas_src>

<mosaic_0001>
module attributes {stable_mosaic.version = 11 : i64} {
  func.func @_adjoint_kernel(%arg0: i32, %arg1: i32, %arg2: memref<1x128x256xf32, #tpu.memory_space<vmem>>, %arg3: memref<64x128xf32, #tpu.memory_space<vmem>>, %arg4: memref<256x128xf32, #tpu.memory_space<vmem>>, %arg5: memref<1x64x128xf32, #tpu.memory_space<vmem>>) attributes {dimension_semantics = [#tpu.dimension_semantics<parallel>, #tpu.dimension_semantics<parallel>], iteration_bounds = array<i64: 2, 1>, scalar_prefetch = 0 : i64, scratch_operands = 0 : i64, tpu.core_type = #tpu.core_type<tc>, window_params = [{transform_indices = @transform_0, window_bounds = array<i64: 1, 128, 256>}, {transform_indices = @transform_1, window_bounds = array<i64: 64, 128>}, {pipeline_mode = #tpu.pipeline_mode<synchronous>, transform_indices = @transform_2, window_bounds = array<i64: 256, 128>}, {transform_indices = @transform_3, window_bounds = array<i64: 1, 64, 128>}]} {
    %c0 = arith.constant 0 : index
    %c0_0 = arith.constant 0 : index
    %0 = vector.load %arg3[%c0, %c0_0] : memref<64x128xf32, #tpu.memory_space<vmem>>, vector<64x128xf32>
    %c0_1 = arith.constant 0 : index
    %c0_2 = arith.constant 0 : index
    %c0_3 = arith.constant 0 : index
    %1 = vector.load %arg2[%c0_1, %c0_2, %c0_3] : memref<1x128x256xf32, #tpu.memory_space<vmem>>, vector<1x128x256xf32>
    %2 = vector.shape_cast %1 : vector<1x128x256xf32> to vector<128x256xf32>
    %cst = arith.constant dense<0.000000e+00> : vector<64x256xf32>
    %3 = tpu.matmul %0, %2, %cst {dimension_numbers = #tpu.dot_dimension_numbers<[1], [0], [0], [1], [0, 0, 1, 1], [], []>} : vector<64x128xf32>, vector<128x256xf32>, vector<64x256xf32> -> vector<64x256xf32>
    %c0_4 = arith.constant 0 : index
    %c0_5 = arith.constant 0 : index
    %4 = vector.load %arg4[%c0_4, %c0_5] : memref<256x128xf32, #tpu.memory_space<vmem>>, vector<256x128xf32>
    %cst_6 = arith.constant dense<0.000000e+00> : vector<64x128xf32>
    %5 = tpu.matmul %3, %4, %cst_6 {dimension_numbers = #tpu.dot_dimension_numbers<[1], [0], [0], [1], [0, 0, 1, 1], [], []>} : vector<64x256xf32>, vector<256x128xf32>, vector<64x128xf32> -> vector<64x128xf32>
    %c0_7 = arith.constant 0 : index
    %c0_8 = arith.constant 0 : index
    %c0_9 = arith.constant 0 : index
    %6 = vector.load %arg5[%c0_7, %c0_8, %c0_9] : memref<1x64x128xf32, #tpu.memory_space<vmem>>, vector<1x64x128xf32>
    %7 = vector.shape_cast %6 : vector<1x64x128xf32> to vector<64x128xf32>
    %8 = vector.shape_cast %5 : vector<64x128xf32> to vector<1x64x128xf32>
    tpu.vector_store %arg5[%c0_7, %c0_8, %c0_9], %8 {strides = array<i32>} : memref<1x64x128xf32, #tpu.memory_space<vmem>>, vector<1x64x128xf32>,
    return
  }
  func.func @transform_0(%arg0: i32, %arg1: i32) -> (i32, i32, i32) {
    %c0_i32 = arith.constant 0 : i32
    %c0_i32_0 = arith.constant 0 : i32
    %c0_i32_1 = arith.constant 0 : i32
    return %arg0, %c0_i32, %c0_i32_0 : i32, i32, i32
  }
  func.func @transform_1(%arg0: i32, %arg1: i32) -> (i32, i32) {
    %c0_i32 = arith.constant 0 : i32
    %c0_i32_0 = arith.constant 0 : i32
    return %arg1, %c0_i32 : i32, i32
  }
  func.func @transform_2(%arg0: i32, %arg1: i32) -> (i32, i32) {
    %c0_i32 = arith.constant 0 : i32
    %c0_i32_0 = arith.constant 0 : i32
    %c0_i32_1 = arith.constant 0 : i32
    return %c0_i32, %c0_i32_0 : i32, i32
  }
  func.func @transform_3(%arg0: i32, %arg1: i32) -> (i32, i32, i32) {
    %c0_i32 = arith.constant 0 : i32
    %c0_i32_0 = arith.constant 0 : i32
    return %arg0, %arg1, %c0_i32 : i32, i32, i32
  }
}

</mosaic_0001>

<bundles_post_ra>
// kernel: tpu_custom_call.1
= control target key start
LH: loop header
LB: loop body
LE: loop exit
PB: predicated region body
PF: predicated region fallthrough
CT: control target
= control target key end

     0   :  { %8 = vsyncpa [#allocation3], 0  ;;  %s1406_s0 = inlined_call_operand.hbm [shape: f32[2,128,256], index: 0, kind: input, shape index: {}]   ;;  %s1407_s1 = inlined_call_operand.hbm [shape: f32[64,128], index: 1, kind: input, shape index: {}]   ;;  %s1408_s2 = inlined_call_operand.hbm [shape: f32[256,128], index: 2, kind: input, shape index: {}]   ;;  %s1409_s3 = inlined_call_operand.hbm [shape: f32[2,64,128], index: 3, kind: output, shape index: {}]  }
   0x1   :  { %10 = vsyncpa [#allocation3 + $0x1], 0 }
   0x2   :  { %11 = vsyncpa [#allocation6], 0 }
   0x3   :  { %12 = vsyncpa [#allocation4], 0 }
   0x4   :  { %14 = vsyncpa [#allocation4 + $0x1], 0  ;;  %s1097_s12 = smov 0   ;;  %s1099_s13 = smov 0  }
   0x5   :  { %s1101_s14 = smov 0   ;;  %s1103_s15 = smov 0  }
   0x6   :  { %s1105_s16 = smov 0   ;;  %s1107_s17 = smov 0  }
   0x7 LB: > { %s661_s18 = sadd.s32 4294967295, %s1064_s17   ;;  %s662_s19 = sadd.s32 4294967294, %s1064_s17   ;;  %s1064_s17 = sphi %s1107_s17, %s20_s17   ;;  %s1060_s16 = sphi %s1105_s16, %s1431_s16   ;;  %s1056_s15 = sphi %s1103_s15, %s1430_s15   ;;  %s1052_s14 = sphi %s1101_s14, %s1429_s14   ;;  %s1048_s13 = sphi %s1099_s13, %s1428_s13   ;;  %s1044_s12 = sphi %s1097_s12, %s1427_s12  }
   0x8   : > { %p52_p0 = scmp.ne.s32.totalorder %s1048_s13, %s1044_s12  ;;  %p1131_p1 = scmp.eq.s32.totalorder %s661_s18, 0 }
   0x9   : > { %p1135_p2 = scmp.eq.s32.totalorder %s661_s18, 1  ;;  %p131_p3 = scmp.eq.s32.totalorder %s662_s19, 1 }
   0xa   : > { %s1414_s20 = scalar_select %p1131_p1, 1, 0 }
   0xb   : > { %p1141_p4 = por %p1131_p1, %p52_p0  ;;  %p663_p5 = scmp.ge.s32.totalorder %s1064_s17, 1 }
   0xc   : > { %p1146_p6 = por %p131_p3, %p52_p0  ;;  %p138_p7 = scmp.lt.s32.totalorder %s1064_s17, 3 }
   0xd   : > { %s1416_s22 = scalar_select %p1141_p4, 1, 0 }
   0xe   : > { %s1417_s23 = scalar_select %p1146_p6, 1, 0 }
   0xf   : > { %p1151_p8 = pnand %p663_p5, %p138_p7  ;;  %s1066_s25 = smov [#allocation5]  }
  0x10   : > { %s153_s26 = sshll.u32 %s1066_s25, 4  ;;  %s1067_s28 = smov [#allocation7]   ;;  %s1155_s26 = int_to_ptr.vmem [resolvable:$true] %s153_s26 }
  0x11   : > { %p814_p9 = pneg %p1151_p8  ;;  %s166_s29 = sshll.u32 %s1067_s28, 4  ;;  %s1166_s29 = int_to_ptr.vmem [resolvable:$true] %s166_s29 }
  0x12   : > { %s892_s5 = scalar_lea.hbm %s1407_s1, 1024 }
  0x13   : > { %p1162_p11 = pnand %p814_p9, %p1131_p1  ;;  %p893_p12 = scmp.ne.s32.totalorder %s1407_s1, %s892_s5 }
  0x14   : > { %p899_p5 = scmp.lt.u32.totalorder %s892_s5, %s1407_s1 }
  0x15   : > { %p894_p13 = pneg %p1162_p11 }
  0x17   : > { %p895_p0 = pnand %p894_p13, %p893_p12 }
  0x19   : > { %p896_p3 = pneg %p895_p0 }
  0x1b   : > { %p901_p7 = pnand %p899_p5, %p896_p3 }
  0x1d   : > { %904 = shalt.err (!%p901_p7)
}
  0x1e   : > { %s905_s10 = scalar_lea.vmem %s1155_s26, 1024  ;;  %p913_p1 = scmp.lt.s32.totalorder %s1155_s26, %s1155_s26 }
  0x1f   : > { %p906_p9 = scmp.ne.s32.totalorder %s1155_s26, %s905_s10  ;;  %p914_p12 = scmp.lt.s32.totalorder %s905_s10, %s905_s10 }
  0x21   : > { %p908_p10 = pnand %p906_p9, %p894_p13  ;;  %p915_p0 = por %p914_p12, %p913_p1 }
  0x23   : > { %p909_p6 = pneg %p908_p10 }
  0x25   : > { %p916_p4 = pnand %p915_p0, %p909_p6 }
  0x27   : > { %919 = shalt.err (!%p916_p4)
}
  0x28   : > { %s1068_s11 = smov 128   ;;  %s1069_s18 = smov 8  }
  0x29   : > { %817 = dma.hbm_to_vmem [thread:$0]  (!%p1162_p11), %s1407_s1, 1024, %s1155_s26, [#allocation6], %s1068_s11, %s1068_s11, %s1069_s18  }
  0x2a   : > { %s920_s4 = scalar_lea.hbm %s1408_s2, 4096 }
  0x2b   : > { %p921_p1 = scmp.ne.s32.totalorder %s1408_s2, %s920_s4  ;;  %p927_p10 = scmp.lt.u32.totalorder %s920_s4, %s1408_s2 }
  0x2d   : > { %p923_p4 = pnand %p921_p1, %p894_p13 }
  0x2f   : > { %p924_p6 = pneg %p923_p4 }
  0x31   : > { %p929_p3 = pnand %p927_p10, %p924_p6 }
  0x33   : > { %932 = shalt.err (!%p929_p3)
}
  0x34   : > { %s933_s26 = scalar_lea.vmem %s1166_s29, 4096  ;;  %p941_p12 = scmp.lt.s32.totalorder %s1166_s29, %s1166_s29 }
  0x35   : > { %p934_p5 = scmp.ne.s32.totalorder %s1166_s29, %s933_s26  ;;  %p942_p0 = scmp.lt.s32.totalorder %s933_s26, %s933_s26 }
  0x37   : > { %p936_p7 = pnand %p934_p5, %p894_p13  ;;  %p943_p1 = por %p942_p0, %p941_p12 }
  0x39   : > { %p937_p9 = pneg %p936_p7 }
  0x3b   : > { %p944_p4 = pnand %p943_p1, %p937_p9 }
  0x3d   : > { %947 = shalt.err (!%p944_p4)
}
  0x3e   : > { %820 = dma.hbm_to_vmem [thread:$0]  (!%p1162_p11), %s1408_s2, 4096, %s1166_s29, [#allocation6], %s1068_s11, %s1068_s11, %s1069_s18  }
  0x3f   : > { %s32_s19 = sadd.s32 1, %s1060_s16  ;;  %s39_s25 = sadd.s32 1, %s1052_s14 }
  0x40   : > { %p34_p13 = scmp.ge.s32.totalorder %s32_s19, 2  ;;  %p46_p6 = scmp.ne.s32.totalorder %s1052_s14, %s1048_s13 }
  0x41   : > { %p47_p10 = scmp.eq.s32.totalorder %s1064_s17, 0  ;;  %p831_p3 = scmp.lt.s32.totalorder %s1064_s17, 2 }
  0x42   : > { %s1433_s19 = smov (%p34_p13, %s32_s19), 0  ;;  %p1230_p7 = por %p1135_p2, %p46_p6 }
  0x43   : > { %p48_p5 = por %p47_p10, %p46_p6  ;;  %s36_s28 = ssub.s32 %s1060_s16, %s1433_s19 }
  0x44   : > { %s1420_s27 = scalar_select %p1230_p7, 1, 0 }
  0x45   : > { %s180_s30 = sand.u32 1, %s1052_s14   ;;  %p37_p9 = scmp.eq.s32.totalorder %s36_s28, 0 }
  0x46   : > { %s667_s29 = sshll.u32 %s180_s30, 8  ;;  %s680_s11 = sshll.u32 %s1060_s16, 12 }
  0x47   : > { %s1239_s18 = scalar_select %p37_p9, %s1052_s14, %s39_s25  }
  0x48   : > { %s1244_s6 = scalar_lea.hbm %s1406_s0, %s680_s11  ;;  %s184_s21 = scalar_lea.vmem [#allocation2], %s667_s29 }
  0x49   : > { %s191_s7 = sshll.u32 %s184_s21, 4  ;;  %p1248_p2 = pnand %p831_p3, %p48_p5  ;;  %s1252_s7 = int_to_ptr.vmem [resolvable:$true] %s191_s7 }
  0x4a   : > { %s1254_s26 = scalar_lea.sflag [#allocation3], %s180_s30  ;;  %s948_s9 = scalar_lea.hbm %s1244_s6, 4096 }
  0x4b   : > { %p949_p11 = scmp.ne.s32.totalorder %s1244_s6, %s948_s9  ;;  %p950_p12 = pneg %p1248_p2 }
  0x4c   : > { %s953_s28 = scalar_lea.hbm %s1406_s0, 8192  ;;  %p954_p4 = scmp.lt.u32.totalorder %s1244_s6, %s1406_s0 }
  0x4d   : > { %p951_p0 = pnand %p950_p12, %p949_p11  ;;  %p955_p13 = scmp.lt.u32.totalorder %s953_s28, %s948_s9 }
  0x4e   : > { %p957_p10 = scmp.lt.u32.totalorder %s948_s9, %s1244_s6 }
  0x4f   : > { %p952_p1 = pneg %p951_p0  ;;  %p956_p6 = por %p955_p13, %p954_p4 }
  0x51   : > { %p958_p3 = por %p957_p10, %p956_p6 }
  0x53   : > { %p959_p5 = pnand %p958_p3, %p952_p1 }
  0x55   : > { %962 = shalt.err (!%p959_p5)
}
  0x56   : > { %s963_s30 = scalar_lea.vmem %s1252_s7, 4096  ;;  %s1070_s4 = smov [#allocation2]  }
  0x57   : > { %p964_p9 = scmp.ne.s32.totalorder %s1252_s7, %s963_s30  ;;  %s968_s5 = sshll.u32 %s1070_s4, 4  ;;  %s969_s5 = int_to_ptr.vmem [resolvable:$false] %s968_s5 }
  0x58   : > { %s970_s21 = scalar_lea.vmem %s969_s5, 8192  ;;  %p971_p7 = scmp.lt.s32.totalorder %s1252_s7, %s969_s5 }
  0x59   : > { %p966_p11 = pnand %p964_p9, %p950_p12  ;;  %p972_p4 = scmp.lt.s32.totalorder %s970_s21, %s963_s30 }
  0x5b   : > { %p967_p0 = pneg %p966_p11  ;;  %p973_p13 = por %p972_p4, %p971_p7 }
  0x5d   : > { %p974_p6 = pnand %p973_p13, %p967_p0 }
  0x5f   : > { %977 = shalt.err (!%p974_p6)
}
  0x60   : > { %s1071_s9 = smov 256   ;;  %s1072_s10 = smov 16  }
  0x61   : > { %824 = dma.hbm_to_vmem [thread:$0]  (!%p1248_p2), %s1244_s6, 4096, %s1252_s7, %s1254_s26, %s1071_s9, %s1071_s9, %s1072_s10  }
  0x62   : > { %203 = sbr.rel (%p1151_p8) target bundleno = 616 (0x268), region = 32  ;;  %s1285_s25 = sand.u32 (!%p1151_p8), 1, %s1048_s13  }
  0x63   : > { %s671_s28 = sshll.u32 (!%p1151_p8), %s1285_s25, 8  ;;  %s206_s29 = scalar_lea.sflag (!%p1151_p8), [#allocation3], %s1285_s25 }
  0x64   : > { %s1289_s11 = scalar_lea.vmem (!%p1151_p8), [#allocation2], %s671_s28  ;;  %p1422_p7 = scmp.ne.s32.totalorder (!%p1151_p8), %s1416_s22, 0 }
  0x69   : > { %1031 = dma.done.wait (%p1422_p7), %s206_s29, 4096  }
  0x6a   : > { %1033 = vsyncadd (%p1422_p7), %s206_s29, 4294963200  ;;  %p1423_p2 = scmp.ne.s32.totalorder %s1414_s20, 0 }
  0x6c   : > { %1035 = dma.done.wait (%p1423_p2), [#allocation6], 5120  }
  0x6d   : > { %1037 = vsyncadd (%p1423_p2), [#allocation6], 4294962176  ;;  %v1073_v0 = vmov 0.0   ;;  %v251_v1 = vld [vmem:[%s1289_s11 + $0x8] sm:$0xff]  ;;  %v253_v2 = vld [vmem:[%s1289_s11 + $0x18] sm:$0xff]  ;;  %s674_s20 = sshll.u32 %s1285_s25, 6 }
  0x6e   : > { %346 = vmatprep.mubr.f32.mxu0 %v1073_v0  ;;  %v250_v3 = vld [vmem:[%s1289_s11] sm:$0xff]  ;;  %v738_v4 = vpack.c.bf16 %v253_v2, %v251_v1  ;;  %v252_v5 = vld [vmem:[%s1289_s11 + $0x10] sm:$0xff]  ;;  %v255_v6 = vld [vmem:[%s1289_s11 + $0x28] sm:$0xff]  ;;  %s1340_s22 = scalar_lea.vmem [#allocation8], %s674_s20  ;;  %s681_s6 = sshll.u32 %s1056_s15, 10 }
  0x6f   : > { %v257_v7 = vld [vmem:[%s1289_s11 + $0x38] sm:$0xff]  ;;  %v740_v8 = vpack.c.bf16 %v252_v5, %v250_v3  ;;  %v254_v10 = vld [vmem:[%s1289_s11 + $0x20] sm:$0xff]  ;;  %v256_v11 = vld [vmem:[%s1289_s11 + $0x30] sm:$0xff]  ;;  %s556_s24 = sshll.u32 %s1340_s22, 4  ;;  %s1356_s26 = scalar_lea.hbm %s1409_s3, %s681_s6  ;;  %s1350_s24 = int_to_ptr.vmem [resolvable:$true] %s556_s24 }
  0x70   : > { %v742_v9 = vpack.c.bf16 %v257_v7, %v255_v6  ;;  %v259_v12 = vld [vmem:[%s1289_s11 + $0x48] sm:$0xff]  ;;  %739 = vmatprep.subr.bf16.mxu0 %v738_v4  ;;  %v261_v13 = vld [vmem:[%s1289_s11 + $0x58] sm:$0xff]  ;;  %v744_v14 = vpack.c.bf16 %v256_v11, %v254_v10  ;;  %v258_v16 = vld [vmem:[%s1289_s11 + $0x40] sm:$0xff]  ;;  %s541_s30 = scalar_lea.sflag [#allocation4], %s1285_s25  ;;  %s978_s4 = scalar_lea.vmem %s1350_s24, 1024 }
  0x71   : > { %741 = vmatpush1.bf16.msra.mxu0 %v740_v8  ;;  %v746_v15 = vpack.c.bf16 %v261_v13, %v259_v12  ;;  %v260_v17 = vld [vmem:[%s1289_s11 + $0x50] sm:$0xff]  ;;  %v263_v18 = vld [vmem:[%s1289_s11 + $0x68] sm:$0xff]  ;;  %v265_v19 = vld [vmem:[%s1289_s11 + $0x78] sm:$0xff]  ;;  %p979_p8 = scmp.ne.s32.totalorder %s1350_s24, %s978_s4  ;;  %p1424_p12 = scmp.ne.s32.totalorder %s1420_s27, 0 }
  0x72   : > { %743 = vmatprep.subr.bf16.mxu0 %v742_v9  ;;  %v748_v20 = vpack.c.bf16 %v260_v17, %v258_v16  ;;  %v750_v21 = vpack.c.bf16 %v265_v19, %v263_v18  ;;  %v262_v22 = vld [vmem:[%s1289_s11 + $0x60] sm:$0xff]  ;;  %v264_v23 = vld [vmem:[%s1289_s11 + $0x70] sm:$0xff]  ;;  %v267_v24 = vld [vmem:[%s1289_s11 + $0x88] sm:$0xff]  ;;  %s1074_s15 = smov [#allocation8]  }
  0x73   : > { %v269_v25 = vld [vmem:[%s1289_s11 + $0x98] sm:$0xff]  ;;  %v752_v26 = vpack.c.bf16 %v264_v23, %v262_v22  ;;  %v266_v27 = vld [vmem:[%s1289_s11 + $0x80] sm:$0xff]  ;;  %v268_v28 = vld [vmem:[%s1289_s11 + $0x90] sm:$0xff]  ;;  %p980_p1 = pnand %p979_p8, %p1424_p12  ;;  %s982_s5 = sshll.u32 %s1074_s15, 4  ;;  %s983_s5 = int_to_ptr.vmem [resolvable:$false] %s982_s5 }
  0x74   : > { %v271_v29 = vld [vmem:[%s1289_s11 + $0xa8] sm:$0xff]  ;;  %v754_v30 = vpack.c.bf16 %v269_v25, %v267_v24  ;;  %v273_v31 = vld [vmem:[%s1289_s11 + $0xb8] sm:$0xff]  ;;  %v411_v32 = vld [vmem:[#allocation7 + $0x80] sm:$0xff]  ;;  %v756_v42 = vpack.c.bf16 %v268_v28, %v266_v27  ;;  %s984_s21 = scalar_lea.vmem %s983_s5, 2048  ;;  %p985_p3 = scmp.lt.s32.totalorder %s1350_s24, %s983_s5 }
  0x75   : > { %745 = vmatpush1.bf16.msra.mxu0 %v744_v14  ;;  %v412_v33 = vld [vmem:[#allocation7 + $0x88] sm:$0xff]  ;;  %v395_v35 = vld [vmem:[#allocation7] sm:$0xff]  ;;  %v413_v37 = vld [vmem:[#allocation7 + $0x90] sm:$0xff]  ;;  %v758_v46 = vpack.c.bf16 %v273_v31, %v271_v29  ;;  %p981_p10 = pneg %p980_p1  ;;  %p986_p5 = scmp.lt.s32.totalorder %s984_s21, %s978_s4 }
  0x76   : > { %747 = vmatprep.subr.bf16.mxu0 %v746_v15  ;;  %v770_v34 = vpack.c.bf16 %v412_v33, %v411_v32  ;;  %v396_v36 = vld [vmem:[#allocation7 + $0x8] sm:$0xff]  ;;  %v414_v39 = vld [vmem:[#allocation7 + $0x98] sm:$0xff]  ;;  %v397_v40 = vld [vmem:[#allocation7 + $0x10] sm:$0xff] }
  0x77   : > { %v772_v38 = vpack.c.bf16 %v396_v36, %v395_v35  ;;  %v398_v41 = vld [vmem:[#allocation7 + $0x18] sm:$0xff]  ;;  %v774_v43 = vpack.c.bf16 %v414_v39, %v413_v37  ;;  %v415_v44 = vld [vmem:[#allocation7 + $0xa0] sm:$0xff]  ;;  %v416_v45 = vld [vmem:[#allocation7 + $0xa8] sm:$0xff]  ;;  %p987_p9 = por %p986_p5, %p985_p3 }
  0x78   : > { %771 = vmatprep.subr.bf16.mxu1 %v770_v34  ;;  %v270_v47 = vld [vmem:[%s1289_s11 + $0xa0] sm:$0xff]  ;;  %v272_v48 = vld [vmem:[%s1289_s11 + $0xb0] sm:$0xff]  ;;  %v275_v49 = vld [vmem:[%s1289_s11 + $0xc8] sm:$0xff]  ;;  %v776_v50 = vpack.c.bf16 %v398_v41, %v397_v40  ;;  %v778_v52 = vpack.c.bf16 %v416_v45, %v415_v44 }
  0x79   : > { %749 = vmatpush1.bf16.msra.mxu0 %v748_v20  ;;  %773 = vmatpush3.bf16.msra.mxu1 %v772_v38  ;;  %v277_v51 = vld [vmem:[%s1289_s11 + $0xd8] sm:$0xff]  ;;  %v399_v53 = vld [vmem:[#allocation7 + $0x20] sm:$0xff]  ;;  %v400_v54 = vld [vmem:[#allocation7 + $0x28] sm:$0xff]  ;;  %v760_v57 = vpack.c.bf16 %v272_v48, %v270_v47  ;;  %p988_p11 = pnand %p987_p9, %p981_p10 }
  0x7a   : > { %751 = vmatprep.subr.bf16.mxu0 %v750_v21  ;;  %775 = vmatprep.subr.bf16.mxu1 %v774_v43  ;;  %v417_v55 = vld [vmem:[#allocation7 + $0xb0] sm:$0xff]  ;;  %v418_v56 = vld [vmem:[#allocation7 + $0xb8] sm:$0xff]  ;;  %v762_v58 = vpack.c.bf16 %v277_v51, %v275_v49  ;;  %v274_v59 = vld [vmem:[%s1289_s11 + $0xc0] sm:$0xff]  ;;  %v780_v62 = vpack.c.bf16 %v400_v54, %v399_v53 }
  0x7b   : > { %v276_v60 = vld [vmem:[%s1289_s11 + $0xd0] sm:$0xff]  ;;  %v279_v61 = vld [vmem:[%s1289_s11 + $0xe8] sm:$0xff]  ;;  %v281_v63 = vld [vmem:[%s1289_s11 + $0xf8] sm:$0xff]  ;;  %v782_v1 = vpack.c.bf16 %v418_v56, %v417_v55 }
  0x7c   : > { %v401_v2 = vld [vmem:[#allocation7 + $0x30] sm:$0xff]  ;;  %v402_v3 = vld [vmem:[#allocation7 + $0x38] sm:$0xff]  ;;  %v419_v4 = vld [vmem:[#allocation7 + $0xc0] sm:$0xff]  ;;  %v764_v6 = vpack.c.bf16 %v276_v60, %v274_v59  ;;  %v766_v7 = vpack.c.bf16 %v281_v63, %v279_v61 }
  0x7d   : > { %753 = vmatpush1.bf16.msra.mxu0 %v752_v26  ;;  %777 = vmatpush3.bf16.msra.mxu1 %v776_v50  ;;  %v420_v5 = vld [vmem:[#allocation7 + $0xc8] sm:$0xff]  ;;  %v278_v8 = vld [vmem:[%s1289_s11 + $0xe0] sm:$0xff]  ;;  %v280_v9 = vld [vmem:[%s1289_s11 + $0xf0] sm:$0xff]  ;;  %v784_v10 = vpack.c.bf16 %v402_v3, %v401_v2 }
  0x7e   : > { %755 = vmatprep.subr.bf16.mxu0 %v754_v30  ;;  %779 = vmatprep.subr.bf16.mxu1 %v778_v52  ;;  %v786_v11 = vpack.c.bf16 %v420_v5, %v419_v4  ;;  %v403_v12 = vld [vmem:[#allocation7 + $0x40] sm:$0xff]  ;;  %v404_v13 = vld [vmem:[#allocation7 + $0x48] sm:$0xff]  ;;  %v421_v14 = vld [vmem:[#allocation7 + $0xd0] sm:$0xff]  ;;  %v768_v16 = vpack.c.bf16 %v280_v9, %v278_v8 }
  0x7f   : > { %v422_v15 = vld [vmem:[#allocation7 + $0xd8] sm:$0xff]  ;;  %v788_v17 = vpack.c.bf16 %v404_v13, %v403_v12  ;;  %v405_v19 = vld [vmem:[#allocation7 + $0x50] sm:$0xff]  ;;  %v423_v21 = vld [vmem:[#allocation7 + $0xe0] sm:$0xff] }
  0x80   : > { %v790_v18 = vpack.c.bf16 %v422_v15, %v421_v14  ;;  %v406_v20 = vld [vmem:[#allocation7 + $0x58] sm:$0xff]  ;;  %v424_v22 = vld [vmem:[#allocation7 + $0xe8] sm:$0xff]  ;;  %v242_v23 = vld [vmem:[#allocation5] sm:$0xff] }
  0x81   : > { %757 = vmatpush1.bf16.msra.mxu0 %v756_v42  ;;  %781 = vmatpush3.bf16.msra.mxu1 %v780_v62  ;;  %v792_v24 = vpack.c.bf16 %v406_v20, %v405_v19  ;;  %v794_v25 = vpack.c.bf16 %v424_v22, %v423_v21  ;;  %v407_v26 = vld [vmem:[#allocation7 + $0x60] sm:$0xff]  ;;  %v408_v27 = vld [vmem:[#allocation7 + $0x68] sm:$0xff]  ;;  %v425_v28 = vld [vmem:[#allocation7 + $0xf0] sm:$0xff] }
  0x82   : > { %759 = vmatprep.subr.bf16.mxu0 %v758_v46  ;;  %783 = vmatprep.subr.bf16.mxu1 %v782_v1  ;;  %v426_v29 = vld [vmem:[#allocation7 + $0xf8] sm:$0xff]  ;;  %v243_v30 = vld [vmem:[#allocation5 + $0x8] sm:$0xff]  ;;  %v796_v31 = vpack.c.bf16 %v408_v27, %v407_v26  ;;  %v244_v33 = vld [vmem:[#allocation5 + $0x10] sm:$0xff] }
  0x83   : > { %v798_v32 = vpack.c.bf16 %v426_v29, %v425_v28  ;;  %v245_v34 = vld [vmem:[#allocation5 + $0x18] sm:$0xff]  ;;  %v246_v35 = vld [vmem:[#allocation5 + $0x20] sm:$0xff]  ;;  %v247_v36 = vld [vmem:[#allocation5 + $0x28] sm:$0xff] }
  0x84   : > { %v248_v37 = vld [vmem:[#allocation5 + $0x30] sm:$0xff]  ;;  %v249_v38 = vld [vmem:[#allocation5 + $0x38] sm:$0xff] }
  0x85   : > { %761 = vmatpush1.bf16.msra.mxu0 %v760_v57  ;;  %785 = vmatpush3.bf16.msra.mxu1 %v784_v10  ;;  %v409_v39 = vld [vmem:[#allocation7 + $0x70] sm:$0xff]  ;;  %v410_v40 = vld [vmem:[#allocation7 + $0x78] sm:$0xff] }
  0x86   : > { %763 = vmatprep.subr.bf16.mxu0 %v762_v58  ;;  %787 = vmatprep.subr.bf16.mxu1 %v786_v11  ;;  %v800_v41 = vpack.c.bf16 %v410_v40, %v409_v39 }
  0x89   : > { %765 = vmatpush1.bf16.msra.mxu0 %v764_v6  ;;  %789 = vmatpush3.bf16.msra.mxu1 %v788_v17 }
  0x8a   : > { %767 = vmatprep.subr.bf16.mxu0 %v766_v7  ;;  %791 = vmatprep.subr.bf16.mxu1 %v790_v18 }
  0x8d   : > { %769 = vmatpush1.bf16.msra.mxu0 %v768_v16  ;;  %793 = vmatpush3.bf16.msra.mxu1 %v792_v24 }
  0x8e   : > { %795 = vmatprep.subr.bf16.mxu1 %v794_v25 }
  0x90   : > { %347 = vmatmul.mubr.f32.vlgmr.msra.gmra.mrb[0].mxu0 %v242_v23 }
  0x91   : > { %352 = vmatprep.mubr.f32.mxu0 %v1073_v0  ;;  %797 = vmatpush3.bf16.msra.mxu1 %v796_v31 }
  0x92   : > { %799 = vmatprep.subr.bf16.mxu1 %v798_v32 }
  0x94   : > { %353 = vmatmul.mubr.f32.gmra.mrb[2].mxu0 %v243_v30 }
  0x95   : > { %358 = vmatprep.mubr.f32.mxu0 %v1073_v0  ;;  %801 = vmatpush3.bf16.msra.mxu1 %v800_v41 }
  0x98   : > { %359 = vmatmul.mubr.f32.gmra.mrb[4].mxu0 %v244_v33 }
  0x99   : > { %364 = vmatprep.mubr.f32.mxu0 %v1073_v0 }
  0x9c   : > { %365 = vmatmul.mubr.f32.gmra.mrb[6].mxu0 %v245_v34 }
  0x9d   : > { %370 = vmatprep.mubr.f32.mxu0 %v1073_v0 }
  0xa0   : > { %371 = vmatmul.mubr.f32.gmra.mrb[8].mxu0 %v246_v35 }
  0xa1   : > { %376 = vmatprep.mubr.f32.mxu0 %v1073_v0 }
  0xa4   : > { %377 = vmatmul.mubr.f32.gmra.mrb[10].mxu0 %v247_v36 }
  0xa5   : > { %382 = vmatprep.mubr.f32.mxu0 %v1073_v0 }
  0xa8   : > { %383 = vmatmul.mubr.f32.gmra.mrb[12].mxu0 %v248_v37 }
  0xa9   : > { %388 = vmatprep.mubr.f32.mxu0 %v1073_v0 }
  0xac   : > { %389 = vmatmul.mubr.f32.gmra.mrb[14].mxu0 %v249_v38 }
 0x163   : > { %v348_v42 = vpop.f32.mrb[0].mxu0 }
 0x164   : > { %v350_v43 = vpop.f32.mrb[1].mxu0 }
 0x165   : > { %491 = vmatprep.mubr.f32.mxu1 %v350_v43 }
 0x166   : > { %492 = vmatmul.mubr.f32.vlgmr.msra.gmra.mrb[0].mxu1 %v348_v42 }
 0x167   : > { %v354_v44 = vpop.f32.mrb[2].mxu0 }
 0x168   : > { %v356_v45 = vpop.f32.mrb[3].mxu0 }
 0x169   : > { %496 = vmatprep.mubr.f32.mxu1 %v356_v45 }
 0x16a   : > { %497 = vmatmul.mubr.f32.gmra.mrb[2].mxu1 %v354_v44 }
 0x16b   : > { %v360_v46 = vpop.f32.mrb[4].mxu0 }
 0x16c   : > { %v362_v47 = vpop.f32.mrb[5].mxu0 }
 0x16d   : > { %501 = vmatprep.mubr.f32.mxu1 %v362_v47 }
 0x16e   : > { %502 = vmatmul.mubr.f32.gmra.mrb[4].mxu1 %v360_v46 }
 0x16f   : > { %v366_v48 = vpop.f32.mrb[6].mxu0 }
 0x170   : > { %v368_v0 = vpop.f32.mrb[7].mxu0 }
 0x171   : > { %506 = vmatprep.mubr.f32.mxu1 %v368_v0 }
 0x172   : > { %507 = vmatmul.mubr.f32.gmra.mrb[6].mxu1 %v366_v48 }
 0x173   : > { %v372_v49 = vpop.f32.mrb[8].mxu0 }
 0x174   : > { %v374_v50 = vpop.f32.mrb[9].mxu0 }
 0x175   : > { %511 = vmatprep.mubr.f32.mxu1 %v374_v50 }
 0x176   : > { %512 = vmatmul.mubr.f32.gmra.mrb[8].mxu1 %v372_v49 }
 0x177   : > { %v378_v51 = vpop.f32.mrb[10].mxu0 }
 0x178   : > { %v380_v52 = vpop.f32.mrb[11].mxu0 }
 0x179   : > { %516 = vmatprep.mubr.f32.mxu1 %v380_v52 }
 0x17a   : > { %517 = vmatmul.mubr.f32.gmra.mrb[10].mxu1 %v378_v51 }
 0x17b   : > { %v384_v53 = vpop.f32.mrb[12].mxu0 }
 0x17c   : > { %v386_v54 = vpop.f32.mrb[13].mxu0 }
 0x17d   : > { %521 = vmatprep.mubr.f32.mxu1 %v386_v54 }
 0x17e   : > { %522 = vmatmul.mubr.f32.gmra.mrb[12].mxu1 %v384_v53 }
 0x17f   : > { %v390_v55 = vpop.f32.mrb[14].mxu0 }
 0x180   : > { %v392_v56 = vpop.f32.mrb[15].mxu0 }
 0x181   : > { %526 = vmatprep.mubr.f32.mxu1 %v392_v56 }
 0x182   : > { %527 = vmatmul.mubr.f32.gmra.mrb[14].mxu1 %v390_v55 }
 0x239   : > { %v714_v57 = vpop.f32.mrb[0].mxu1 }
 0x23a   : > { %v715_v58 = vpop.f32.mrb[1].mxu1 }
 0x23b   : > { %v716_v59 = vadd.f32 %v715_v58, %v714_v57 }
 0x23d   : > { %532 = vst [vmem:[%s1340_s22] sm:$0xff] %v716_v59  ;;  %v717_v60 = vpop.f32.mrb[2].mxu1 }
 0x23e   : > { %v718_v61 = vpop.f32.mrb[3].mxu1 }
 0x23f   : > { %v719_v62 = vadd.f32 %v718_v61, %v717_v60 }
 0x241   : > { %533 = vst [vmem:[%s1340_s22 + $0x8] sm:$0xff] %v719_v62  ;;  %v720_v63 = vpop.f32.mrb[4].mxu1 }
 0x242   : > { %v721_v1 = vpop.f32.mrb[5].mxu1 }
 0x243   : > { %v722_v2 = vadd.f32 %v721_v1, %v720_v63 }
 0x245   : > { %534 = vst [vmem:[%s1340_s22 + $0x10] sm:$0xff] %v722_v2  ;;  %v723_v3 = vpop.f32.mrb[6].mxu1 }
 0x246   : > { %v724_v4 = vpop.f32.mrb[7].mxu1 }
 0x247   : > { %v725_v5 = vadd.f32 %v724_v4, %v723_v3 }
 0x249   : > { %535 = vst [vmem:[%s1340_s22 + $0x18] sm:$0xff] %v725_v5  ;;  %v726_v6 = vpop.f32.mrb[8].mxu1 }
 0x24a   : > { %v727_v7 = vpop.f32.mrb[9].mxu1 }
 0x24b   : > { %v728_v8 = vadd.f32 %v727_v7, %v726_v6 }
 0x24d   : > { %536 = vst [vmem:[%s1340_s22 + $0x20] sm:$0xff] %v728_v8  ;;  %v729_v9 = vpop.f32.mrb[10].mxu1 }
 0x24e   : > { %v730_v10 = vpop.f32.mrb[11].mxu1 }
 0x24f   : > { %v731_v11 = vadd.f32 %v730_v10, %v729_v9 }
 0x251   : > { %537 = vst [vmem:[%s1340_s22 + $0x28] sm:$0xff] %v731_v11  ;;  %v732_v12 = vpop.f32.mrb[12].mxu1 }
 0x252   : > { %v733_v13 = vpop.f32.mrb[13].mxu1 }
 0x253   : > { %v734_v14 = vadd.f32 %v733_v13, %v732_v12 }
 0x255   : > { %538 = vst [vmem:[%s1340_s22 + $0x30] sm:$0xff] %v734_v14  ;;  %v735_v15 = vpop.f32.mrb[14].mxu1 }
 0x256   : > { %v736_v16 = vpop.f32.mrb[15].mxu1 }
 0x257   : > { %v737_v17 = vadd.f32 %v736_v16, %v735_v15 }
 0x259   : > { %539 = vst [vmem:[%s1340_s22 + $0x38] sm:$0xff] %v737_v17 }
 0x25a   : > { %991 = shalt.err (!%p988_p11)
}
 0x25b   : > { %s992_s9 = scalar_lea.hbm %s1356_s26, 1024  ;;  %s996_s29 = scalar_lea.hbm %s1409_s3, 2048 }
 0x25c   : > { %p993_p0 = scmp.ne.s32.totalorder %s1356_s26, %s992_s9  ;;  %p997_p6 = scmp.lt.u32.totalorder %s1356_s26, %s1409_s3 }
 0x25d   : > { %p998_p7 = scmp.lt.u32.totalorder %s996_s29, %s992_s9  ;;  %p1000_p8 = scmp.lt.u32.totalorder %s992_s9, %s1356_s26 }
 0x25e   : > { %p994_p4 = pnand %p993_p0, %p1424_p12 }
 0x25f   : > { %p999_p2 = por %p998_p7, %p997_p6 }
 0x260   : > { %p995_p13 = pneg %p994_p4 }
 0x261   : > { %p1001_p1 = por %p1000_p8, %p999_p2 }
 0x263   : > { %p1002_p10 = pnand %p1001_p1, %p995_p13 }
 0x265   : > { %1005 = shalt.err (!%p1002_p10)
}
 0x266   : > { %s1075_s22 = smov 128   ;;  %s1076_s6 = smov 8  }
 0x267   : > { %812 = dma.vmem_to_hbm [thread:$0]  (%p1424_p12), %s1350_s24, 1024, %s1356_s26, %s541_s30, %s1075_s22, %s1075_s22, %s1076_s6  }
 0x268 PF: > { %s571_s7 = sand.u32 1, %s1044_s12   ;;  %p1425_p3 = scmp.ne.s32.totalorder %s1417_s23, 0 }
 0x269   : > { %p1426_p5 = scmp.ge.s32.totalorder %s1064_s17, 2  ;;  %s572_s8 = scalar_lea.sflag [#allocation4], %s571_s7 }
 0x26b   : > { %p826_p9 = pnand %p1426_p5, %p1425_p3 }
 0x26d   : > { %1039 = dma.done.wait (!%p826_p9), %s572_s8, 1024  }
 0x26e   : > { %1041 = vsyncadd (!%p826_p9), %s572_s8, 4294966272  ;;  %s20_s17 = sadd.s32 1, %s1064_s17   ;;  %s1427_s12 = smov %s1048_s13 }
 0x26f   : > { %p17_p11 = scmp.ge.s32.totalorder %s20_s17, 4   ;;  %s1428_s13 = smov %s1052_s14 }
 0x270   : > { %s1429_s14 = smov %s1239_s18  ;;  %s1430_s15 = smov %s1060_s16 }
 0x271   : > { %s1431_s16 = smov %s1433_s19  ;;  %19 = sbr.rel (!%p17_p11) target bundleno = 7 (0x7), region = 86 }
 0x278   :  { %577 = vsyncpa [#allocation3], 1 }
 0x279   :  { %579 = vsyncpa [#allocation3 + $0x1], 1 }
 0x27a   :  { %580 = vsyncpa [#allocation6], 1 }
 0x27b   :  { %581 = vsyncpa [#allocation4], 1 }
 0x27c   :  { %583 = vsyncpa [#allocation4 + $0x1], 1 }

</bundles_post_ra>
